<compile_context>
chip_gen: v7x
topology: tpu7x:2x2x1
jax: 0.10.0
libtpu: 0.0.40
codegen_flags: <defaults>
</compile_context>

<pallas_src>
import jax
import jax.numpy as jnp
from jax.experimental import pallas as pl
from jax.experimental.pallas import tpu as pltpu


def _round_up(x, m):
    return ((x + m - 1) // m) * m


def _vmem_capacity_bytes():
    # Generation-aware: v5e/v6e have 128 MiB VMEM per core, v7x has 64 MiB.
    try:
        return int(pltpu.get_tpu_info().vmem_capacity_bytes)
    except Exception:  # query unavailable -> assume the smallest (v7x)
        return 64 * 1024 * 1024


def _vmem_limit_bytes():
    cap = _vmem_capacity_bytes()
    return min(int(cap * 0.7), 64 * 1024 * 1024)


def _pick_column_tile(bytes_per_col, L, *, fixed_bytes=0):
    """Largest column tile (multiple of 256) whose double-buffered working set
    fits the generation-aware VMEM budget."""
    budget = int(_vmem_capacity_bytes() * 0.45)
    tn = 256
    for cand in (8192, 4096, 2048, 1024, 512, 256):
        if fixed_bytes + 2 * cand * bytes_per_col <= budget:
            tn = cand
            break
    # Never pad beyond the smallest multiple of 256 that covers L.
    return min(tn, 256 * pl.cdiv(L, 256))


def _pick_norm_tile(l_pad, tn_start, cpad):
    """Column tile for the normalize pass: divides l_pad, multiple of 128, fits VMEM."""
    budget = int(_vmem_capacity_bytes() * 0.45)
    per_col = cpad * (2 + 4)  # bf16 in + f32 out per column
    cand = tn_start
    while cand >= 128:
        if l_pad % cand == 0 and cand % 128 == 0 and 2 * cand * per_col <= budget:
            return cand
        cand //= 2
    return 128


# ---------------------------------------------------------------------------
# Kernel 1: 1x1 conv (MXU matmul) + fused per-channel BN statistics.
# ---------------------------------------------------------------------------
def _conv1x1_stats_kernel(w_ref, x_ref, y_ref, sum_ref, sq_ref):
    # w_ref: (Cout_pad, Cin) bf16 (resident), x_ref: (Cin, TN) bf16 (streamed)
    # y_ref: (Cout_pad, TN) bf16, sum_ref/sq_ref: (Cout_pad, 1) f32 resident accumulators
    acc = jnp.dot(w_ref[...], x_ref[...], preferred_element_type=jnp.float32)
    y_ref[...] = acc.astype(y_ref.dtype)
    # Stats from the f32 accumulator (before the bf16 downcast).  Zero-padded
    # columns contribute exactly 0 to both sums.
    part_sum = jnp.sum(acc, axis=1, keepdims=True)
    part_sq = jnp.sum(acc * acc, axis=1, keepdims=True)

    @pl.when(pl.program_id(0) == 0)
    def _():
        sum_ref[...] = part_sum
        sq_ref[...] = part_sq

    @pl.when(pl.program_id(0) != 0)
    def _():
        sum_ref[...] = sum_ref[...] + part_sum
        sq_ref[...] = sq_ref[...] + part_sq


def conv1x1_stats_pallas(w2d, x2d, *, tn):
    cout_pad, cin = w2d.shape
    _, l_pad = x2d.shape
    assert l_pad % tn == 0
    return pl.pallas_call(
        _conv1x1_stats_kernel,
        out_shape=(
            jax.ShapeDtypeStruct((cout_pad, l_pad), jnp.bfloat16),
            jax.ShapeDtypeStruct((cout_pad, 1), jnp.float32),
            jax.ShapeDtypeStruct((cout_pad, 1), jnp.float32),
        ),
        grid_spec=pltpu.PrefetchScalarGridSpec(
            num_scalar_prefetch=0,
            grid=(l_pad // tn,),
            in_specs=[
                pl.BlockSpec((cout_pad, cin), lambda c: (0, 0)),  # weight: constant index -> 1 DMA
                pl.BlockSpec((cin, tn), lambda c: (0, c)),        # activations: streamed once
            ],
            out_specs=(
                pl.BlockSpec((cout_pad, tn), lambda c: (0, c)),   # lane-dense bf16 slab
                pl.BlockSpec((cout_pad, 1), lambda c: (0, 0)),    # resident sum accumulator
                pl.BlockSpec((cout_pad, 1), lambda c: (0, 0)),    # resident sumsq accumulator
            ),
        ),
        compiler_params=pltpu.CompilerParams(
            # Column axis carries the running BN-stat accumulation -> arbitrary.
            dimension_semantics=("arbitrary",),
            vmem_limit_bytes=_vmem_limit_bytes(),
        ),
    )(w2d, x2d)


# ---------------------------------------------------------------------------
# Kernel 2: tiled per-channel scale/shift (the BN normalize pass).
# ---------------------------------------------------------------------------
def _normalize_kernel(y_ref, scale_ref, shift_ref, o_ref):
    o_ref[...] = y_ref[...].astype(jnp.float32) * scale_ref[...] + shift_ref[...]


def normalize_pallas(y2d, scale, shift, *, tn):
    cpad, l_pad = y2d.shape
    assert l_pad % tn == 0
    return pl.pallas_call(
        _normalize_kernel,
        out_shape=jax.ShapeDtypeStruct((cpad, l_pad), jnp.float32),
        grid_spec=pltpu.PrefetchScalarGridSpec(
            num_scalar_prefetch=0,
            grid=(l_pad // tn,),
            in_specs=[
                pl.BlockSpec((cpad, tn), lambda c: (0, c)),
                pl.BlockSpec((cpad, 1), lambda c: (0, 0)),
                pl.BlockSpec((cpad, 1), lambda c: (0, 0)),
            ],
            out_specs=pl.BlockSpec((cpad, tn), lambda c: (0, c)),
        ),
        compiler_params=pltpu.CompilerParams(
            dimension_semantics=("parallel",),  # v7x: column tiles shard across both TCs
            vmem_limit_bytes=_vmem_limit_bytes(),
        ),
    )(y2d, scale, shift)


# ---------------------------------------------------------------------------
# Wrappers (layout plumbing only).
# ---------------------------------------------------------------------------
def conv1x1_bn_slab(x, w, *, stride):
    """1x1 conv (bias=False, padding=0, stride) with fused per-channel stats.

    Returns (y2d bf16 (Cout_pad, L_pad), sum f32, sumsq f32, dims)."""
    n, cin, _, _ = x.shape
    cout = w.shape[0]

    # Cast to bf16 BEFORE subsample/transpose/pad (halves wrapper-side traffic).
    xs = x.astype(jnp.bfloat16)[:, :, ::stride, ::stride]  # exact for k=1, p=0
    ho, wo = xs.shape[2], xs.shape[3]
    L = n * ho * wo

    cout_pad = _round_up(cout, 8)
    per_col = cin * 2 + cout_pad * 2                     # X bf16 + Y bf16, per column
    fixed = cout_pad * cin * 2 + 4 * cout_pad * 4        # resident weight + stats
    tn = _pick_column_tile(per_col, L, fixed_bytes=fixed)
    l_pad = tn * pl.cdiv(L, tn)

    x2d = jnp.transpose(xs, (1, 0, 2, 3)).reshape(cin, L)
    x2d = jnp.pad(x2d, ((0, 0), (0, l_pad - L)))
    w2d = jnp.pad(w.reshape(cout, cin).astype(jnp.bfloat16),
                  ((0, cout_pad - cout), (0, 0)))

    y2d, ysum, ysq = conv1x1_stats_pallas(w2d, x2d, tn=tn)
    dims = dict(n=n, cout=cout, ho=ho, wo=wo, L=L, tn=tn)
    return y2d, ysum, ysq, dims


def bn_normalize_slab(y2d, ysum, ysq, gamma, beta, *, count, eps, tn):
    """Normalize a lane-dense slab given fused sum/sumsq statistics."""
    cpad, l_pad = y2d.shape
    inv_n = 1.0 / float(count)
    mean = ysum * inv_n
    var = jnp.maximum(ysq * inv_n - mean * mean, 0.0)    # guard f32 cancellation
    inv_std = jax.lax.rsqrt(var + jnp.float32(eps))
    scale = gamma * inv_std                              # (cpad, 1)
    shift = beta - mean * scale                          # (cpad, 1)
    tn_norm = _pick_norm_tile(l_pad, tn, cpad)
    return normalize_pallas(y2d, scale, shift, tn=tn_norm)


def slab_to_nchw(y2d, *, n, cout, ho, wo, L):
    y = y2d[:cout, :L].reshape(cout, n, ho, wo)
    return jnp.transpose(y, (1, 0, 2, 3))


# ---------------------------------------------------------------------------
# Module ports
# ---------------------------------------------------------------------------
class HansGruberNI:
    # TODO(synk): HansGruberNI source not provided -- stochastic relative-error
    # injection (random/line error models) not reproduced; pass-through here.
    def __init__(self, error_model="random", p=0.01, inject_epoch=0):
        self.error_model, self.p, self.inject_epoch = error_model, p, inject_epoch

    def __call__(self, x, inject=True, current_epoch=0):
        return x


class ConvInjector:
    def __init__(self, inplanes, outplanes, kernel_size=3, stride=1, padding=0,
                 error_model="random", inject_p=0.01, inject_epoch=0, *, key):
        assert kernel_size == 1 and padding == 0, \
            "Shortcut path: only 1x1 conv with padding=0 implemented"
        self.stride = stride
        fan_in = inplanes * kernel_size * kernel_size
        bound = 1.0 / float(fan_in) ** 0.5
        self.weight = jax.random.uniform(
            key, (outplanes, inplanes, kernel_size, kernel_size),
            minval=-bound, maxval=bound, dtype=jnp.float32)
        self.injector = HansGruberNI(error_model, inject_p, inject_epoch)

    def forward_slab(self, x, inject=True, current_epoch=0, counter=0, inject_index=0):
        """Fused path used by Shortcut: keeps the lane-dense slab (no NCHW round trip)."""
        y2d, ysum, ysq, dims = conv1x1_bn_slab(x, self.weight, stride=self.stride)
        if counter == inject_index:
            y2d = self.injector(y2d, inject, current_epoch)
        counter += 1
        return y2d, ysum, ysq, dims, counter, inject_index

    def __call__(self, x, inject=True, current_epoch=0, counter=0, inject_index=0):
        y2d, _, _, dims, counter, inject_index = self.forward_slab(
            x, inject, current_epoch, counter, inject_index)
        out = slab_to_nchw(y2d.astype(jnp.float32), n=dims["n"], cout=dims["cout"],
                           ho=dims["ho"], wo=dims["wo"], L=dims["L"])
        return out, counter, inject_index


class BatchNorm2d:
    def __init__(self, num_features, affine=True, eps=1e-5):
        self.num_features, self.affine, self.eps = num_features, affine, eps
        self.weight = jnp.ones((num_features,), jnp.float32) if affine else None
        self.bias = jnp.zeros((num_features,), jnp.float32) if affine else None
        # TODO(synk): running_mean/var buffers not tracked (stateless); matches
        # PyTorch training-mode normalization with batch statistics.

    def _padded_affine(self, cpad):
        g = self.weight if self.affine else jnp.ones((self.num_features,), jnp.float32)
        b = self.bias if self.affine else jnp.zeros((self.num_features,), jnp.float32)
        g = jnp.pad(g, (0, cpad - self.num_features)).reshape(cpad, 1)
        b = jnp.pad(b, (0, cpad - self.num_features)).reshape(cpad, 1)
        return g, b

    def normalize_slab(self, y2d, ysum, ysq, *, count, tn):
        g, b = self._padded_affine(y2d.shape[0])
        return bn_normalize_slab(y2d, ysum, ysq, g, b, count=count, eps=self.eps, tn=tn)

    def __call__(self, x):
        # Standalone NCHW path (Shortcut uses the fused slab path instead).
        n, c, h, w = x.shape
        L = n * h * w
        cpad = _round_up(c, 8)
        tn = _pick_column_tile(cpad * 8, L)
        l_pad = tn * pl.cdiv(L, tn)
        x2d = jnp.transpose(x, (1, 0, 2, 3)).reshape(c, L).astype(jnp.float32)
        x2d = jnp.pad(x2d, ((0, cpad - c), (0, l_pad - L)))
        ysum = jnp.sum(x2d, axis=1, keepdims=True)
        ysq = jnp.sum(x2d * x2d, axis=1, keepdims=True)
        y = self.normalize_slab(x2d, ysum, ysq, count=L, tn=tn)
        return slab_to_nchw(y, n=n, cout=c, ho=h, wo=w, L=L)


class Shortcut:
    """JAX/Pallas port of utils/models/hard_resnet.py::Shortcut.

    conv(1x1, stride) -> injector -> BatchNorm2d(batch stats), fused so that the
    dominant (Cout, N*Ho*Wo) intermediate is written once (bf16, lane-dense) and
    read once by the normalize pass; NCHW is rebuilt once at the end.
    """

    def __init__(self, inplanes, outplanes, stride, affine, error_model,
                 inject_p, inject_epoch, *, key):
        self.conv = ConvInjector(inplanes, outplanes, kernel_size=1, stride=stride,
                                 error_model=error_model, inject_p=inject_p,
                                 inject_epoch=inject_epoch, key=key)
        self.bn = BatchNorm2d(outplanes, affine=affine)

    def __call__(self, x, inject=True, current_epoch=0, counter=0, inject_index=0):
        y2d, ysum, ysq, dims, counter, inject_index = self.conv.forward_slab(
            x, inject, current_epoch, counter, inject_index)
        out2d = self.bn.normalize_slab(y2d, ysum, ysq, count=dims["L"], tn=dims["tn"])
        out = slab_to_nchw(out2d, n=dims["n"], cout=dims["cout"],
                           ho=dims["ho"], wo=dims["wo"], L=dims["L"])
        return out, counter


if __name__ == "__main__":
    key = jax.random.PRNGKey(0)
    k_w, k_x = jax.random.split(key)

    N, C_IN, C_OUT, H, W = 2, 4, 8, 16, 16
    x = jax.random.normal(k_x, (N, C_IN, H, W), dtype=jnp.float32)

    for stride in (1, 2):
        sc = Shortcut(C_IN, C_OUT, stride=stride, affine=True,
                      error_model="random", inject_p=0.01, inject_epoch=0, key=k_w)
        out, counter = sc(x, inject=True, current_epoch=0, counter=0, inject_index=0)
        out = jax.block_until_ready(out)

        # Reference: XLA conv with the same bf16 input cast + f32 accumulation,
        # followed by training-mode BatchNorm (batch stats, biased variance).
        w = sc.conv.weight
        ref_conv = jax.lax.conv_general_dilated(
            x.astype(jnp.bfloat16), w.astype(jnp.bfloat16),
            window_strides=(stride, stride), padding="VALID",
            dimension_numbers=("NCHW", "OIHW", "NCHW"),
            preferred_element_type=jnp.float32)
        mean = ref_conv.mean(axis=(0, 2, 3), keepdims=True)
        var = ref_conv.var(axis=(0, 2, 3), keepdims=True)
        ref = (ref_conv - mean) / jnp.sqrt(var + sc.bn.eps)

        ho = (H - 1) // stride + 1
        assert out.shape == (N, C_OUT, ho, ho), out.shape
        assert counter == 1
        err = float(jnp.max(jnp.abs(out - ref)))
        assert jnp.allclose(out, ref, atol=5e-3, rtol=5e-3), err

    print("KERNEL_OK")
</pallas_src>

<mosaic_0001>
module attributes {stable_mosaic.version = 11 : i64} {
  func.func @_conv1x1_stats_kernel(%arg0: i32, %arg1: memref<8x4xbf16, #tpu.memory_space<vmem>>, %arg2: memref<4x512xbf16, #tpu.memory_space<vmem>>, %arg3: memref<8x512xbf16, #tpu.memory_space<vmem>>, %arg4: memref<8x1xf32, #tpu.memory_space<vmem>>, %arg5: memref<8x1xf32, #tpu.memory_space<vmem>>) attributes {dimension_semantics = [#tpu.dimension_semantics<arbitrary>], iteration_bounds = array<i64: 1>, scalar_prefetch = 0 : i64, scratch_operands = 0 : i64, tpu.core_type = #tpu.core_type<tc>, window_params = [{pipeline_mode = #tpu.pipeline_mode<synchronous>, transform_indices = @transform_0, window_bounds = array<i64: 8, 4>}, {transform_indices = @transform_1, window_bounds = array<i64: 4, 512>}, {transform_indices = @transform_2, window_bounds = array<i64: 8, 512>}, {pipeline_mode = #tpu.pipeline_mode<synchronous>, transform_indices = @transform_3, window_bounds = array<i64: 8, 1>}, {pipeline_mode = #tpu.pipeline_mode<synchronous>, transform_indices = @transform_4, window_bounds = array<i64: 8, 1>}]} {
    %c0 = arith.constant 0 : index
    %c0_0 = arith.constant 0 : index
    %0 = vector.load %arg1[%c0, %c0_0] : memref<8x4xbf16, #tpu.memory_space<vmem>>, vector<8x4xbf16>
    %c0_1 = arith.constant 0 : index
    %c0_2 = arith.constant 0 : index
    %1 = vector.load %arg2[%c0_1, %c0_2] : memref<4x512xbf16, #tpu.memory_space<vmem>>, vector<4x512xbf16>
    %cst = arith.constant dense<0.000000e+00> : vector<8x512xf32>
    %2 = tpu.matmul %0, %1, %cst {dimension_numbers = #tpu.dot_dimension_numbers<[1], [0], [0], [1], [0, 0, 1, 1], [], []>} : vector<8x4xbf16>, vector<4x512xbf16>, vector<8x512xf32> -> vector<8x512xf32>
    %3 = arith.truncf %2 : vector<8x512xf32> to vector<8x512xbf16>
    %c0_3 = arith.constant 0 : index
    %c0_4 = arith.constant 0 : index
    %4 = vector.load %arg3[%c0_3, %c0_4] : memref<8x512xbf16, #tpu.memory_space<vmem>>, vector<8x512xbf16>
    tpu.vector_store %arg3[%c0_3, %c0_4], %3 {strides = array<i32>} : memref<8x512xbf16, #tpu.memory_space<vmem>>, vector<8x512xbf16>,
    %cst_5 = arith.constant dense<0.000000e+00> : vector<8xf32>
    %5 = vector.multi_reduction <add>, %2, %cst_5 [1] : vector<8x512xf32> to vector<8xf32>
    %6 = vector.shape_cast %5 : vector<8xf32> to vector<8x1xf32>
    %7 = arith.mulf %2, %2 : vector<8x512xf32>
    %cst_6 = arith.constant dense<0.000000e+00> : vector<8xf32>
    %8 = vector.multi_reduction <add>, %7, %cst_6 [1] : vector<8x512xf32> to vector<8xf32>
    %9 = vector.shape_cast %8 : vector<8xf32> to vector<8x1xf32>
    %c0_i32 = arith.constant 0 : i32
    %10 = arith.cmpi eq, %arg0, %c0_i32 : i32
    %11 = arith.extui %10 : i1 to i32
    %c0_i32_7 = arith.constant 0 : i32
    %12 = arith.cmpi ne, %11, %c0_i32_7 : i32
    scf.if %12 {
      %c0_10 = arith.constant 0 : index
      %c0_11 = arith.constant 0 : index
      %16 = vector.load %arg4[%c0_10, %c0_11] : memref<8x1xf32, #tpu.memory_space<vmem>>, vector<8x1xf32>
      tpu.vector_store %arg4[%c0_10, %c0_11], %6 {strides = array<i32>} : memref<8x1xf32, #tpu.memory_space<vmem>>, vector<8x1xf32>,
      %c0_12 = arith.constant 0 : index
      %c0_13 = arith.constant 0 : index
      %17 = vector.load %arg5[%c0_12, %c0_13] : memref<8x1xf32, #tpu.memory_space<vmem>>, vector<8x1xf32>
      tpu.vector_store %arg5[%c0_12, %c0_13], %9 {strides = array<i32>} : memref<8x1xf32, #tpu.memory_space<vmem>>, vector<8x1xf32>,
    } else {
    }
    %c0_i32_8 = arith.constant 0 : i32
    %13 = arith.cmpi ne, %arg0, %c0_i32_8 : i32
    %14 = arith.extui %13 : i1 to i32
    %c0_i32_9 = arith.constant 0 : i32
    %15 = arith.cmpi ne, %14, %c0_i32_9 : i32
    scf.if %15 {
      %c0_10 = arith.constant 0 : index
      %c0_11 = arith.constant 0 : index
      %16 = vector.load %arg4[%c0_10, %c0_11] : memref<8x1xf32, #tpu.memory_space<vmem>>, vector<8x1xf32>
      %17 = arith.addf %16, %6 : vector<8x1xf32>
      %c0_12 = arith.constant 0 : index
      %c0_13 = arith.constant 0 : index
      %18 = vector.load %arg4[%c0_12, %c0_13] : memref<8x1xf32, #tpu.memory_space<vmem>>, vector<8x1xf32>
      tpu.vector_store %arg4[%c0_12, %c0_13], %17 {strides = array<i32>} : memref<8x1xf32, #tpu.memory_space<vmem>>, vector<8x1xf32>,
      %c0_14 = arith.constant 0 : index
      %c0_15 = arith.constant 0 : index
      %19 = vector.load %arg5[%c0_14, %c0_15] : memref<8x1xf32, #tpu.memory_space<vmem>>, vector<8x1xf32>
      %20 = arith.addf %19, %9 : vector<8x1xf32>
      %c0_16 = arith.constant 0 : index
      %c0_17 = arith.constant 0 : index
      %21 = vector.load %arg5[%c0_16, %c0_17] : memref<8x1xf32, #tpu.memory_space<vmem>>, vector<8x1xf32>
      tpu.vector_store %arg5[%c0_16, %c0_17], %20 {strides = array<i32>} : memref<8x1xf32, #tpu.memory_space<vmem>>, vector<8x1xf32>,
    } else {
    }
    return
  }
  func.func @transform_0(%arg0: i32) -> (i32, i32) {
    %c0_i32 = arith.constant 0 : i32
    %c0_i32_0 = arith.constant 0 : i32
    %c0_i32_1 = arith.constant 0 : i32
    return %c0_i32, %c0_i32_0 : i32, i32
  }
  func.func @transform_1(%arg0: i32) -> (i32, i32) {
    %c0_i32 = arith.constant 0 : i32
    %c0_i32_0 = arith.constant 0 : i32
    return %c0_i32, %arg0 : i32, i32
  }
  func.func @transform_2(%arg0: i32) -> (i32, i32) {
    %c0_i32 = arith.constant 0 : i32
    %c0_i32_0 = arith.constant 0 : i32
    return %c0_i32, %arg0 : i32, i32
  }
  func.func @transform_3(%arg0: i32) -> (i32, i32) {
    %c0_i32 = arith.constant 0 : i32
    %c0_i32_0 = arith.constant 0 : i32
    %c0_i32_1 = arith.constant 0 : i32
    return %c0_i32, %c0_i32_0 : i32, i32
  }
  func.func @transform_4(%arg0: i32) -> (i32, i32) {
    %c0_i32 = arith.constant 0 : i32
    %c0_i32_0 = arith.constant 0 : i32
    %c0_i32_1 = arith.constant 0 : i32
    return %c0_i32, %c0_i32_0 : i32, i32
  }
}

</mosaic_0001>

<bundles_post_ra>
// kernel: tpu_custom_call.1
= control target key start
LH: loop header
LB: loop body
LE: loop exit
PB: predicated region body
PF: predicated region fallthrough
CT: control target
= control target key end

     0   :  { %v23_v1 = vlaneseq  ;;  %v243_v2 = vmov 1983009808   ;;  %v244_v4 = vmov 0   ;;  %s295_s0 = inlined_call_operand.vmem [shape: bf16[8,4], index: 0, kind: input, shape index: {}]   ;;  %s296_s1 = inlined_call_operand.vmem [shape: bf16[4,512], index: 1, kind: input, shape index: {}]   ;;  %s297_s2 = inlined_call_operand.hbm [shape: bf16[8,512], index: 2, kind: output, shape index: {0}]   ;;  %s298_s3 = inlined_call_operand.vmem [shape: f32[8,1], index: 3, kind: output, shape index: {1}]   ;;  %s299_s4 = inlined_call_operand.vmem [shape: f32[8,1], index: 4, kind: output, shape index: {2}]  }
   0x1   :  { %v17_v0 = vld [vmem:[%s296_s1] sm:$0xff]  ;;  %v21_v3 = vunpack.c.l.s4 %v243_v2  ;;  %85 = vmatprep.mubr.bf16.mxu0 %v244_v4  ;;  %126 = vmatprep.mubr.bf16.mxu1 %v244_v4 }
   0x2   :  { %10 = vsyncpa [#allocation3], 0  ;;  %v24_v5 = vshrl.u32 %v23_v1, 7  ;;  %v19_v7 = vcombine.high %v17_v0, %v17_v0  ;;  %vm40_vm0 = vcmask 1041408   ;;  %v16_v15 = vld [vmem:[%s295_s0] sm:$0xf] }
   0x3   :  { %v22_v6 = vunpack.c.0.s8 %v21_v3  ;;  %vm36_vm1 = vcmask 31744   ;;  %s245_s0 = smov [#allocation2]  }
   0x4   :  { %s191_s18 = sshll.u32 %s245_s0, 4  ;;  %s192_s18 = int_to_ptr.vmem [resolvable:$true] %s191_s18 }
   0x5   :  { %v25_v8 = vsub.s32 %v22_v6, %v24_v5  ;;  %s219_s19 = scalar_lea.vmem %s192_s18, 256  ;;  %p224_p1 = scmp.lt.s32.totalorder %s192_s18, %s192_s18 }
   0x6   :  { %p220_p0 = scmp.ne.s32.totalorder %s192_s18, %s219_s19  ;;  %p225_p2 = scmp.lt.s32.totalorder %s219_s19, %s219_s19 }
   0x7   :  { %v26_v9 = vrot.slane %v17_v0, %v25_v8  ;;  %v33_v10 = vrot.slane %v19_v7, %v25_v8 }
   0x8   :  { %p226_p3 = por %p225_p2, %p224_p1 }
   0x9   :  { %v34_v11 = vcombine.high %v26_v9, %v26_v9  ;;  %v35_v12 = vcombine.high %v33_v10, %v33_v10  ;;  %v42_v13 = vsel %vm40_vm0, %v26_v9, 0  ;;  %v48_v14 = vsel %vm40_vm0, %v33_v10, 0 }
   0xa   :  { %p227_p4 = pnand %p226_p3, %p220_p0 }
   0xb   :  { %207 = vmatprep.subr.msk.bf16.mxu0 %vm40_vm0, %v34_v11  ;;  %209 = vmatprep.subr.msk.bf16.mxu1 %vm40_vm0, %v35_v12 }
   0xc   :  { %54 = vmatpush1.bf16.msra.mxu0 %v42_v13  ;;  %95 = vmatpush1.bf16.msra.mxu1 %v48_v14 }
   0xf   :  { %208 = vmatmul.mubr.msk.bf16.vlgmr.msra.gmra.mrb[0].mxu0 %vm36_vm1, %v16_v15  ;;  %210 = vmatmul.mubr.msk.bf16.vlgmr.msra.gmra.mrb[0].mxu1 %vm36_vm1, %v16_v15 }
  0xe2   :  { %v87_v16 = vpop.f32.mrb[0].mxu0  ;;  %v128_v17 = vpop.f32.mrb[0].mxu1 }
  0xe3   :  { %v158_v18 = vmul.f32 %v87_v16, %v87_v16  ;;  %v160_v19 = vmul.f32 %v128_v17, %v128_v17  ;;  %v89_v20 = vpop.f32.mrb[1].mxu0  ;;  %v130_v21 = vpop.f32.mrb[1].mxu1 }
  0xe4   :  { %v213_v22 = vpack.c.bf16 %v89_v20, %v87_v16  ;;  %v153_v23 = vadd.f32 %v89_v20, %v87_v16  ;;  %v159_v24 = vmul.f32 %v89_v20, %v89_v20  ;;  %v214_v25 = vpack.c.bf16 %v130_v21, %v128_v17  ;;  %v91_v26 = vpop.f32.mrb[2].mxu0  ;;  %v132_v27 = vpop.f32.mrb[2].mxu1 }
  0xe5   :  { %v92_v28 = vpop.f32.mrb[3].mxu0  ;;  %v133_v29 = vpop.f32.mrb[3].mxu1  ;;  %v161_v33 = vmul.f32 %v130_v21, %v130_v21 }
  0xe6   :  { %151 = vst [vmem:[#allocation2] sm:$0xff] %v213_v22  ;;  %152 = vst [vmem:[#allocation2 + $0x8] sm:$0xff] %v214_v25  ;;  %v154_v30 = vadd.f32 %v153_v23, %v128_v17  ;;  %v162_v31 = vadd.f32 %v159_v24, %v158_v18 }
  0xe8   :  { %v155_v32 = vadd.f32 %v154_v30, %v130_v21  ;;  %v163_v34 = vadd.f32 %v162_v31, %v160_v19 }
  0xea   :  { %156 = vadd.xlane.f32.xlu0 %v155_v32  ;;  %v164_v35 = vadd.f32 %v163_v34, %v161_v33 }
  0xee   :  { %165 = vadd.xlane.f32.xlu0 %v164_v35 }
  0xef   :  { %230 = shalt.err (!%p227_p4)
}
  0xf0   :  { %s231_s22 = scalar_lea.hbm %s297_s2, 256 }
  0xf1   :  { %p232_p5 = scmp.ne.s32.totalorder %s297_s2, %s231_s22  ;;  %p235_p6 = scmp.lt.u32.totalorder %s231_s22, %s297_s2 }
  0xf3   :  { %p237_p7 = pnand %p235_p6, %p232_p5 }
  0xf5   :  { %240 = shalt.err (!%p237_p7)
}
  0xf6   :  { %194 = dma.vmem_to_hbm [thread:$0]  %s192_s18, 256, %s297_s2, [#allocation3]   ;;  %vm171_vm2 = vcmask 7168  }
 0x177   :  { %v157_v36 = vpop.xlane.xlu0 %156 }
 0x178   :  { %172 = vst.msk [vmem:[%s298_s3] sm:$0xff] %vm171_vm2, %v157_v36 }
 0x17b   :  { %v166_v37 = vpop.xlane.xlu0 %165 }
 0x17c   :  { %173 = vst.msk [vmem:[%s299_s4] sm:$0xff] %vm171_vm2, %v166_v37 }
 0x17d   :  { %241 = dma.done.wait [#allocation3], 256  }
 0x17e   :  { %242 = vsyncadd [#allocation3], 4294967040 }
 0x17f   :  { %206 = vsyncpa [#allocation3], 1 }

</bundles_post_ra>
